<compile_context>
chip_gen: v6e
topology: v6e:2x2x1
jax: 0.10.0
libtpu: 0.0.40
codegen_flags: <defaults>
</compile_context>

<pallas_src>
import functools
import numpy as np
import jax
import jax.numpy as jnp
from jax import lax
from jax.experimental import pallas as pl
from jax.experimental.pallas import tpu as pltpu

_VMEM_LIMIT = 48 * 1024 * 1024      # leaves headroom on v7x's 64 MiB VMEM per TC


def _round_up(x, m):
    return (x + m - 1) // m * m


def _row_tile(m, cap):
    return min(cap, _round_up(m, 8))


def _cparams(sem):
    return pltpu.CompilerParams(dimension_semantics=sem,
                                vmem_limit_bytes=_VMEM_LIMIT)


# ----------------------- row-tiled matmul-family kernels ----------------------
# Rows (tokens) are tiled with BlockSpec((TM, K), lambda i: (i, 0)); weights use a
# constant index_map so they stay VMEM resident across the row loop.  Matmul
# operands are cast to bf16 (MXU rate / HBM bytes); LN / GELU / bias math is f32.

def _linear_kernel(x_ref, w_ref, b_ref, o_ref):
    y = jnp.dot(x_ref[...].astype(jnp.bfloat16), w_ref[...],
                preferred_element_type=jnp.float32) + b_ref[...]
    o_ref[...] = y.astype(o_ref.dtype)


def linear(x2d, w, b):
    """y = x2d @ w + b ;  x2d:(M,K)  w:(K,N)  b:(N,)"""
    M, K = x2d.shape
    N = w.shape[1]
    tm = _row_tile(M, 512)
    Mp = _round_up(M, tm)
    xp = x2d if Mp == M else jnp.pad(x2d, ((0, Mp - M), (0, 0)))
    out = pl.pallas_call(
        _linear_kernel,
        out_shape=jax.ShapeDtypeStruct((Mp, N), jnp.float32),
        grid=(Mp // tm,),
        in_specs=[
            pl.BlockSpec((tm, K), lambda i: (i, 0)),
            pl.BlockSpec((K, N), lambda i: (0, 0)),
            pl.BlockSpec((1, N), lambda i: (0, 0)),
        ],
        out_specs=pl.BlockSpec((tm, N), lambda i: (i, 0)),
        compiler_params=_cparams(("parallel",)),
    )(xp.astype(jnp.float32), w.astype(jnp.bfloat16),
      b.reshape(1, N).astype(jnp.float32))
    return out if Mp == M else out[:M]


def _ln_linear_kernel(x_ref, g_ref, bt_ref, w_ref, b_ref, o_ref):
    x = x_ref[...].astype(jnp.float32)
    mu = jnp.mean(x, axis=-1, keepdims=True)
    var = jnp.mean(jnp.square(x - mu), axis=-1, keepdims=True)
    xn = (x - mu) * lax.rsqrt(var + 1e-5) * g_ref[...] + bt_ref[...]   # LN eps=1e-5
    y = jnp.dot(xn.astype(jnp.bfloat16), w_ref[...],
                preferred_element_type=jnp.float32) + b_ref[...]
    o_ref[...] = y.astype(o_ref.dtype)


def ln_linear(x2d, g, bt, w, b):
    """y = LayerNorm(x2d) @ w + b (LN1 fused into the qkv matmul)."""
    M, K = x2d.shape
    N = w.shape[1]
    tm = _row_tile(M, 512)
    Mp = _round_up(M, tm)
    xp = x2d if Mp == M else jnp.pad(x2d, ((0, Mp - M), (0, 0)))
    out = pl.pallas_call(
        _ln_linear_kernel,
        out_shape=jax.ShapeDtypeStruct((Mp, N), jnp.float32),
        grid=(Mp // tm,),
        in_specs=[
            pl.BlockSpec((tm, K), lambda i: (i, 0)),
            pl.BlockSpec((1, K), lambda i: (0, 0)),
            pl.BlockSpec((1, K), lambda i: (0, 0)),
            pl.BlockSpec((K, N), lambda i: (0, 0)),
            pl.BlockSpec((1, N), lambda i: (0, 0)),
        ],
        out_specs=pl.BlockSpec((tm, N), lambda i: (i, 0)),
        compiler_params=_cparams(("parallel",)),
    )(xp.astype(jnp.float32), g.reshape(1, K).astype(jnp.float32),
      bt.reshape(1, K).astype(jnp.float32), w.astype(jnp.bfloat16),
      b.reshape(1, N).astype(jnp.float32))
    return out if Mp == M else out[:M]


def _ln_mlp_res_kernel(x_ref, g_ref, bt_ref, w1_ref, b1_ref, w2_ref, b2_ref, o_ref):
    x = x_ref[...].astype(jnp.float32)
    mu = jnp.mean(x, axis=-1, keepdims=True)
    var = jnp.mean(jnp.square(x - mu), axis=-1, keepdims=True)
    xn = (x - mu) * lax.rsqrt(var + 1e-5) * g_ref[...] + bt_ref[...]
    h = jnp.dot(xn.astype(jnp.bfloat16), w1_ref[...],
                preferred_element_type=jnp.float32) + b1_ref[...]
    h = 0.5 * h * (1.0 + lax.erf(h * 0.7071067811865476))          # exact GELU
    y = jnp.dot(h.astype(jnp.bfloat16), w2_ref[...],
                preferred_element_type=jnp.float32) + b2_ref[...]
    o_ref[...] = (x + y).astype(o_ref.dtype)                        # fused residual


def ln_mlp_residual(x2d, g, bt, w1, b1, w2, b2):
    """x + MLP(LayerNorm(x)) fused in one pass over the tokens."""
    M, C = x2d.shape
    Hd = w1.shape[1]
    tm = _row_tile(M, 256)          # smaller row tile: fc1/fc2 are VMEM resident
    Mp = _round_up(M, tm)
    xp = x2d if Mp == M else jnp.pad(x2d, ((0, Mp - M), (0, 0)))
    out = pl.pallas_call(
        _ln_mlp_res_kernel,
        out_shape=jax.ShapeDtypeStruct((Mp, C), jnp.float32),
        grid=(Mp // tm,),
        in_specs=[
            pl.BlockSpec((tm, C), lambda i: (i, 0)),
            pl.BlockSpec((1, C), lambda i: (0, 0)),
            pl.BlockSpec((1, C), lambda i: (0, 0)),
            pl.BlockSpec((C, Hd), lambda i: (0, 0)),
            pl.BlockSpec((1, Hd), lambda i: (0, 0)),
            pl.BlockSpec((Hd, C), lambda i: (0, 0)),
            pl.BlockSpec((1, C), lambda i: (0, 0)),
        ],
        out_specs=pl.BlockSpec((tm, C), lambda i: (i, 0)),
        compiler_params=_cparams(("parallel",)),
    )(xp.astype(jnp.float32), g.reshape(1, C).astype(jnp.float32),
      bt.reshape(1, C).astype(jnp.float32), w1.astype(jnp.bfloat16),
      b1.reshape(1, Hd).astype(jnp.float32), w2.astype(jnp.bfloat16),
      b2.reshape(1, C).astype(jnp.float32))
    return out if Mp == M else out[:M]


# ------------------------------ attention kernels -----------------------------
# One grid step handles one (image, window) with ALL heads folded in-kernel; the
# output block is lane-dense (L, C) with heads concatenated on the feature axis.
# Relative-position bias is a small VMEM-resident (nh, L, L) block; the shifted
# window mask is indexed per window -- nothing is broadcast/materialized in HBM.

def _mha_heads(q, k, v, add_bias, store, nh, hd, scale, out_dtype):
    for h in range(nh):
        sl = slice(h * hd, (h + 1) * hd)
        qh = q[:, sl].astype(jnp.bfloat16)
        kh = k[:, sl].astype(jnp.bfloat16)
        vh = v[:, sl].astype(jnp.bfloat16)
        s = lax.dot_general(qh, kh, (((1,), (1,)), ((), ())),
                            preferred_element_type=jnp.float32) * scale
        s = add_bias(h, s)
        s = s - jnp.max(s, axis=-1, keepdims=True)
        p = jnp.exp(s)
        p = p * pl.reciprocal(jnp.sum(p, axis=-1, keepdims=True), approx=True)
        oh = lax.dot_general(p.astype(jnp.bfloat16), vh, (((1,), (0,)), ((), ())),
                             preferred_element_type=jnp.float32)
        store(sl, oh.astype(out_dtype))


def _win_attn_mask_kernel(q_ref, k_ref, v_ref, rb_ref, m_ref, o_ref, *, nh, hd, scale):
    q, k, v = q_ref[0, 0], k_ref[0, 0], v_ref[0, 0]
    m = m_ref[0]

    def add_bias(h, s):
        return s + rb_ref[h] + m

    def store(sl, val):
        o_ref[0, 0, :, sl] = val

    _mha_heads(q, k, v, add_bias, store, nh, hd, scale, o_ref.dtype)


def _win_attn_kernel(q_ref, k_ref, v_ref, rb_ref, o_ref, *, nh, hd, scale):
    q, k, v = q_ref[0, 0], k_ref[0, 0], v_ref[0, 0]

    def add_bias(h, s):
        return s + rb_ref[h]

    def store(sl, val):
        o_ref[0, 0, :, sl] = val

    _mha_heads(q, k, v, add_bias, store, nh, hd, scale, o_ref.dtype)


def _self_attn_kernel(q_ref, k_ref, v_ref, o_ref, *, nh, hd, scale):
    q, k, v = q_ref[0], k_ref[0], v_ref[0]

    def store(sl, val):
        o_ref[0, :, sl] = val

    _mha_heads(q, k, v, lambda h, s: s, store, nh, hd, scale, o_ref.dtype)


def window_attention(q, k, v, rel_bias, mask, num_heads):
    """q,k,v: (B, nW, L, C) f32; rel_bias: (nh, L, L); mask: (nW, L, L) or None."""
    B, nW, L, C = q.shape
    hd = C // num_heads
    scale = hd ** (-0.5)
    qkv_spec = pl.BlockSpec((1, 1, L, C), lambda b, w: (b, w, 0, 0))
    rb_spec = pl.BlockSpec((num_heads, L, L), lambda b, w: (0, 0, 0))   # resident
    out_spec = pl.BlockSpec((1, 1, L, C), lambda b, w: (b, w, 0, 0))    # lane-dense
    if mask is not None:
        kern = functools.partial(_win_attn_mask_kernel, nh=num_heads, hd=hd, scale=scale)
        in_specs = [qkv_spec, qkv_spec, qkv_spec, rb_spec,
                    pl.BlockSpec((1, L, L), lambda b, w: (w, 0, 0))]
        args = (q, k, v, rel_bias.astype(jnp.float32), mask.astype(jnp.float32))
    else:
        kern = functools.partial(_win_attn_kernel, nh=num_heads, hd=hd, scale=scale)
        in_specs = [qkv_spec, qkv_spec, qkv_spec, rb_spec]
        args = (q, k, v, rel_bias.astype(jnp.float32))
    return pl.pallas_call(
        kern,
        out_shape=jax.ShapeDtypeStruct((B, nW, L, C), jnp.float32),
        grid=(B, nW),
        in_specs=in_specs,
        out_specs=out_spec,
        compiler_params=_cparams(("parallel", "parallel")),
    )(*args)


def det_attention(q, k, v, num_heads):
    """[DET] x [DET] self attention.  q,k,v: (B, T, C) f32, bias-free."""
    B, T, C = q.shape
    hd = C // num_heads
    scale = hd ** (-0.5)
    spec = pl.BlockSpec((1, T, C), lambda b: (b, 0, 0))
    return pl.pallas_call(
        functools.partial(_self_attn_kernel, nh=num_heads, hd=hd, scale=scale),
        out_shape=jax.ShapeDtypeStruct((B, T, C), jnp.float32),
        grid=(B,),
        in_specs=[spec, spec, spec],
        out_specs=spec,
        compiler_params=_cparams(("parallel",)),
    )(q, k, v)


# ------------------------------- glue (JAX / np) ------------------------------

def window_partition_bn(x, ws):
    """(B, Hp, Wp, Ch) -> (B, nW, ws*ws, Ch)"""
    B, Hp, Wp, Ch = x.shape
    x = x.reshape(B, Hp // ws, ws, Wp // ws, ws, Ch)
    return x.transpose(0, 1, 3, 2, 4, 5).reshape(B, (Hp // ws) * (Wp // ws), ws * ws, Ch)


def window_reverse_bn(win, ws, Hp, Wp):
    """(B, nW, ws*ws, Ch) -> (B, Hp, Wp, Ch)"""
    B = win.shape[0]
    Ch = win.shape[-1]
    x = win.reshape(B, Hp // ws, Wp // ws, ws, ws, Ch)
    return x.transpose(0, 1, 3, 2, 4, 5).reshape(B, Hp, Wp, Ch)


def relative_position_index(ws):
    coords = np.stack(np.meshgrid(np.arange(ws), np.arange(ws), indexing="ij"))
    cf = coords.reshape(2, -1)
    rel = cf[:, :, None] - cf[:, None, :]
    rel = rel.transpose(1, 2, 0).copy()
    rel[:, :, 0] += ws - 1
    rel[:, :, 1] += ws - 1
    rel[:, :, 0] *= 2 * ws - 1
    return rel.sum(-1)                       # (ws*ws, ws*ws)


def build_attn_mask(Hp, Wp, ws, shift):
    img_mask = np.zeros((1, Hp, Wp, 1), np.float32)
    slices = (slice(0, -ws), slice(-ws, -shift), slice(-shift, None))
    cnt = 0
    for h in slices:
        for w in slices:
            img_mask[:, h, w, :] = cnt
            cnt += 1
    mw = img_mask.reshape(1, Hp // ws, ws, Wp // ws, ws, 1)
    mw = mw.transpose(0, 1, 3, 2, 4, 5).reshape(-1, ws * ws)
    am = mw[:, None, :] - mw[:, :, None]
    am = np.where(am != 0, -100.0, 0.0).astype(np.float32)
    return jnp.asarray(am)                   # (nW, ws*ws, ws*ws)


def swin_block(x, H, W, pos_qkv, attn_mask, shift_size, window_size, num_heads, p):
    """One SwinTransformerBlock with RAM attention (cross_attn=False)."""
    B, Lall, C = x.shape
    HW = H * W
    ws = window_size
    L = ws * ws
    shortcut = x

    # ---- fused LN1 + qkv over all tokens (patch + det) ----
    qkv_all = ln_linear(x.reshape(-1, C), p["norm1_g"], p["norm1_b"],
                        p["qkv_w"], p["qkv_b"]).reshape(B, Lall, 3 * C)
    patch_qkv = qkv_all[:, :HW, :]
    # det positional embedding folded in via linearity: qkv(n + pos) = qkv(n) + pos @ W
    det_qkv = qkv_all[:, HW:, :] + pos_qkv[None]                         # (B, T, 3C)

    # ---- pad (padded tokens get qkv(0) = qkv_b, as in the reference) / shift ----
    pq = patch_qkv.reshape(B, H, W, 3 * C)
    pad_r = (ws - W % ws) % ws
    pad_b = (ws - H % ws) % ws
    if pad_r > 0 or pad_b > 0:
        pq = jnp.pad(pq, ((0, 0), (0, pad_b), (0, pad_r), (0, 0)))
        valid = jnp.pad(jnp.ones((1, H, W, 1), jnp.float32),
                        ((0, 0), (0, pad_b), (0, pad_r), (0, 0)))
        pq = pq + (1.0 - valid) * p["qkv_b"].astype(jnp.float32)
    Hp, Wp = H + pad_b, W + pad_r

    if shift_size > 0:
        pq = jnp.roll(pq, shift=(-shift_size, -shift_size), axis=(1, 2))
        mask = attn_mask
    else:
        mask = None

    # ---- window MSA over [PATCH] tokens (all heads per grid step) ----
    win = window_partition_bn(pq, ws)                                    # (B,nW,L,3C)
    q, k, v = win[..., :C], win[..., C:2 * C], win[..., 2 * C:]
    win_out = window_attention(q, k, v, p["rel_bias"], mask, num_heads)  # (B,nW,L,C)

    # ---- [DET] x [DET] self attention ----
    dq, dk, dv = det_qkv[..., :C], det_qkv[..., C:2 * C], det_qkv[..., 2 * C:]
    det_out = det_attention(dq, dk, dv, num_heads)                       # (B,T,C)

    # ---- shared output projection (still in the shifted / padded frame) ----
    patch_out = window_reverse_bn(win_out, ws, Hp, Wp).reshape(B, Hp * Wp, C)
    xo = jnp.concatenate([patch_out, det_out], axis=1)
    xo = linear(xo.reshape(-1, C), p["proj_w"], p["proj_b"]).reshape(B, Hp * Wp + det_out.shape[1], C)
    patch_proj = xo[:, :Hp * Wp, :].reshape(B, Hp, Wp, C)
    det_proj = xo[:, Hp * Wp:, :]

    # ---- un-shift / un-pad ----
    if shift_size > 0:
        patch_proj = jnp.roll(patch_proj, shift=(shift_size, shift_size), axis=(1, 2))
    if pad_r > 0 or pad_b > 0:
        patch_proj = patch_proj[:, :H, :W, :]

    x = shortcut + jnp.concatenate([patch_proj.reshape(B, HW, C), det_proj], axis=1)

    # ---- fused LN2 + MLP (GELU) + residual ----
    x = ln_mlp_residual(x.reshape(-1, C), p["norm2_g"], p["norm2_b"],
                        p["fc1_w"], p["fc1_b"], p["fc2_w"], p["fc2_b"]).reshape(B, Lall, C)
    return x


def basic_layer_forward(x, H, W, det_pos, params, window_size, num_heads):
    shift_size = window_size // 2
    Hp = int(np.ceil(H / window_size)) * window_size
    Wp = int(np.ceil(W / window_size)) * window_size
    attn_mask = build_attn_mask(Hp, Wp, window_size, shift_size)
    C = x.shape[-1]
    T = det_pos.shape[1]
    Pd = det_pos.shape[-1]
    for i, p in enumerate(params["blocks"]):
        ss = 0 if i % 2 == 0 else shift_size
        # det positional contribution to qkv, computed once per block (tiny)
        det_pos_emb = linear(det_pos.reshape(T, Pd), p["det_pos_w"], p["det_pos_b"])   # (T, C)
        pos_qkv = linear(det_pos_emb, p["qkv_w"], jnp.zeros((3 * C,), jnp.float32))    # (T, 3C)
        x = swin_block(x, H, W, pos_qkv, attn_mask, ss, window_size, num_heads, p)
    # downsample is None -> same return signature as the PyTorch module
    return x, H, W, x, H, W


# ------------------------------- params init ----------------------------------

def init_block_params(key, dim, num_heads, window_size, mlp_ratio, det_pos_dim):
    ks = jax.random.split(key, 6)
    hidden = int(dim * mlp_ratio)
    num_rel = (2 * window_size - 1) ** 2
    L = window_size * window_size

    def w(k, shape, scale=0.02):
        return (scale * jax.random.normal(k, shape)).astype(jnp.float32)

    # gather the relative-position bias once (static data), stored as (nh, L, L)
    table = w(ks[1], (num_rel, num_heads))
    idx = jnp.asarray(relative_position_index(window_size).reshape(-1), jnp.int32)
    rel_bias = table[idx].reshape(L, L, num_heads).transpose(2, 0, 1)

    return {
        "norm1_g": jnp.ones((dim,), jnp.float32),
        "norm1_b": jnp.zeros((dim,), jnp.float32),
        "qkv_w": w(ks[0], (dim, 3 * dim)),
        "qkv_b": jnp.zeros((3 * dim,), jnp.float32),
        "rel_bias": rel_bias,
        "proj_w": w(ks[2], (dim, dim)),
        "proj_b": jnp.zeros((dim,), jnp.float32),
        "norm2_g": jnp.ones((dim,), jnp.float32),
        "norm2_b": jnp.zeros((dim,), jnp.float32),
        "fc1_w": w(ks[3], (dim, hidden)),
        "fc1_b": jnp.zeros((hidden,), jnp.float32),
        "fc2_w": w(ks[4], (hidden, dim)),
        "fc2_b": jnp.zeros((dim,), jnp.float32),
        "det_pos_w": w(ks[5], (det_pos_dim, dim)),
        "det_pos_b": jnp.zeros((dim,), jnp.float32),
    }


# ----------------------------------- main --------------------------------------

if __name__ == "__main__":
    B, C, H, W = 2, 32, 8, 8
    window_size, num_heads, depth = 4, 4, 2
    mlp_ratio = 4.0
    det_token_num, det_pos_dim = 8, 32

    key = jax.random.PRNGKey(0)
    kx, kd, kp = jax.random.split(key, 3)
    x = jax.random.normal(kx, (B, H * W + det_token_num, C), jnp.float32)
    det_pos = jax.random.normal(kd, (1, det_token_num, det_pos_dim), jnp.float32)

    bkeys = jax.random.split(kp, depth)
    params = {"blocks": [init_block_params(bkeys[i], C, num_heads, window_size,
                                           mlp_ratio, det_pos_dim)
                         for i in range(depth)]}

    x_out, Ho, Wo, x_down, Wh, Ww = basic_layer_forward(
        x, H, W, det_pos, params, window_size, num_heads)
    jax.block_until_ready(x_out)
    assert x_out.shape == (B, H * W + det_token_num, C)
    assert (Ho, Wo, Wh, Ww) == (H, W, H, W)
    assert bool(jnp.all(jnp.isfinite(x_out)))
    print("KERNEL_OK")
</pallas_src>

<mosaic_0001>
module attributes {stable_mosaic.version = 11 : i64} {
  func.func @_linear_kernel(%arg0: i32, %arg1: memref<8x32xf32, #tpu.memory_space<vmem>>, %arg2: memref<32x32xbf16, #tpu.memory_space<vmem>>, %arg3: memref<1x32xf32, #tpu.memory_space<vmem>>, %arg4: memref<8x32xf32, #tpu.memory_space<vmem>>) attributes {dimension_semantics = [#tpu.dimension_semantics<parallel>], iteration_bounds = array<i64: 1>, scalar_prefetch = 0 : i64, scratch_operands = 0 : i64, tpu.core_type = #tpu.core_type<tc>, window_params = [{transform_indices = @transform_0, window_bounds = array<i64: 8, 32>}, {pipeline_mode = #tpu.pipeline_mode<synchronous>, transform_indices = @transform_1, window_bounds = array<i64: 32, 32>}, {pipeline_mode = #tpu.pipeline_mode<synchronous>, transform_indices = @transform_2, window_bounds = array<i64: 1, 32>}, {transform_indices = @transform_3, window_bounds = array<i64: 8, 32>}]} {
    %c0 = arith.constant 0 : index
    %c0_0 = arith.constant 0 : index
    %0 = vector.load %arg1[%c0, %c0_0] : memref<8x32xf32, #tpu.memory_space<vmem>>, vector<8x32xf32>
    %1 = arith.truncf %0 : vector<8x32xf32> to vector<8x32xbf16>
    %c0_1 = arith.constant 0 : index
    %c0_2 = arith.constant 0 : index
    %2 = vector.load %arg2[%c0_1, %c0_2] : memref<32x32xbf16, #tpu.memory_space<vmem>>, vector<32x32xbf16>
    %cst = arith.constant dense<0.000000e+00> : vector<8x32xf32>
    %3 = tpu.matmul %1, %2, %cst {dimension_numbers = #tpu.dot_dimension_numbers<[1], [0], [0], [1], [0, 0, 1, 1], [], []>} : vector<8x32xbf16>, vector<32x32xbf16>, vector<8x32xf32> -> vector<8x32xf32>
    %c0_3 = arith.constant 0 : index
    %c0_4 = arith.constant 0 : index
    %4 = vector.load %arg3[%c0_3, %c0_4] : memref<1x32xf32, #tpu.memory_space<vmem>>, vector<1x32xf32>
    %5 = vector.broadcast %4 : vector<1x32xf32> to vector<8x32xf32>
    %6 = arith.addf %3, %5 : vector<8x32xf32>
    %c0_5 = arith.constant 0 : index
    %c0_6 = arith.constant 0 : index
    %7 = vector.load %arg4[%c0_5, %c0_6] : memref<8x32xf32, #tpu.memory_space<vmem>>, vector<8x32xf32>
    tpu.vector_store %arg4[%c0_5, %c0_6], %6 {strides = array<i32>} : memref<8x32xf32, #tpu.memory_space<vmem>>, vector<8x32xf32>,
    return
  }
  func.func @transform_0(%arg0: i32) -> (i32, i32) {
    %c0_i32 = arith.constant 0 : i32
    %c0_i32_0 = arith.constant 0 : i32
    return %arg0, %c0_i32 : i32, i32
  }
  func.func @transform_1(%arg0: i32) -> (i32, i32) {
    %c0_i32 = arith.constant 0 : i32
    %c0_i32_0 = arith.constant 0 : i32
    %c0_i32_1 = arith.constant 0 : i32
    return %c0_i32, %c0_i32_0 : i32, i32
  }
  func.func @transform_2(%arg0: i32) -> (i32, i32) {
    %c0_i32 = arith.constant 0 : i32
    %c0_i32_0 = arith.constant 0 : i32
    %c0_i32_1 = arith.constant 0 : i32
    return %c0_i32, %c0_i32_0 : i32, i32
  }
  func.func @transform_3(%arg0: i32) -> (i32, i32) {
    %c0_i32 = arith.constant 0 : i32
    %c0_i32_0 = arith.constant 0 : i32
    return %arg0, %c0_i32 : i32, i32
  }
}

</mosaic_0001>

<bundles_post_ra>
// kernel: tpu_custom_call.1
= control target key start
LH: loop header
LB: loop body
LE: loop exit
PB: predicated region body
PF: predicated region fallthrough
CT: control target
= control target key end

     0   :  { %8 = vsyncpa [#allocation3], 0  ;;  %s257_s0 = inlined_call_operand.hbm [shape: f32[8,32], index: 0, kind: input, shape index: {}]   ;;  %s258_s1 = inlined_call_operand.hbm [shape: bf16[32,32], index: 1, kind: input, shape index: {}]   ;;  %s259_s2 = inlined_call_operand.vmem [shape: f32[1,32], index: 2, kind: input, shape index: {}]   ;;  %s260_s3 = inlined_call_operand.hbm [shape: f32[8,32], index: 3, kind: output, shape index: {}]  }
   0x1   :  { %9 = vsyncpa [#allocation6], 0 }
   0x2   :  { %10 = vsyncpa [#allocation4], 0  ;;  %s218_s12 = smov [#allocation2]   ;;  %s219_s14 = smov [#allocation5]  }
   0x3   :  { %s17_s13 = sshll.u32 %s218_s12, 4  ;;  %s26_s15 = sshll.u32 %s219_s14, 4  ;;  %s18_s13 = int_to_ptr.vmem [resolvable:$true] %s17_s13  ;;  %s27_s15 = int_to_ptr.vmem [resolvable:$true] %s26_s15 }
   0x4   :  { %s160_s16 = scalar_lea.vmem %s18_s13, 128  ;;  %p165_p1 = scmp.lt.s32.totalorder %s18_s13, %s18_s13 }
   0x5   :  { %p161_p0 = scmp.ne.s32.totalorder %s18_s13, %s160_s16  ;;  %p166_p2 = scmp.lt.s32.totalorder %s160_s16, %s160_s16 }
   0x7   :  { %p167_p3 = por %p166_p2, %p165_p1 }
   0x9   :  { %p168_p4 = pnand %p167_p3, %p161_p0 }
   0xb   :  { %171 = shalt.err (!%p168_p4)
}
   0xc   :  { %20 = dma.hbm_to_vmem [thread:$0]  %s257_s0, 128, %s18_s13, [#allocation3]  }
   0xd   :  { %s180_s19 = scalar_lea.vmem %s27_s15, 256  ;;  %p185_p6 = scmp.lt.s32.totalorder %s27_s15, %s27_s15 }
   0xe   :  { %p181_p5 = scmp.ne.s32.totalorder %s27_s15, %s180_s19  ;;  %p186_p7 = scmp.lt.s32.totalorder %s180_s19, %s180_s19 }
  0x10   :  { %p187_p8 = por %p186_p7, %p185_p6 }
  0x12   :  { %p188_p9 = pnand %p187_p8, %p181_p5 }
  0x14   :  { %191 = shalt.err (!%p188_p9)
}
  0x15   :  { %s220_s20 = smov 64   ;;  %s221_s21 = smov 4  }
  0x16   :  { %32 = dma.hbm_to_vmem [thread:$0]  %s258_s1, 256, %s27_s15, [#allocation6], %s220_s20, %s220_s20, %s221_s21  }
  0x17   :  { %212 = dma.done.wait [#allocation3], 128  }
  0x18   :  { %213 = vsyncadd [#allocation3], 4294967168 }
  0x19   :  { %214 = dma.done.wait [#allocation6], 256  }
  0x1a   :  { %215 = vsyncadd [#allocation6], 4294967040  ;;  %v222_v0 = vmov 0.0   ;;  %vm223_vm0 = vmmov 0   ;;  %v150_v1 = vld [vmem:[#allocation5 + $0x8] sm:$0xff]   ;;  %v151_v2 = vld [vmem:[#allocation5] sm:$0xff]  }
  0x1b   :  { %135 = vmatprep.subr.bf16.mxu0 %v222_v0  ;;  %139 = vmatprep.mubr.msk.bf16.mxu0 %vm223_vm0, %v222_v0  ;;  %v42_v3 = vld [vmem:[#allocation2] sm:$0xff]  ;;  %vm67_vm1 = vcmask 261120   ;;  %s224_s1 = smov [#allocation7]  }
  0x1c   :  { %136 = vmatpush3.bf16.msra.mxu0 %v150_v1  ;;  %v43_v4 = vpack.c.bf16 %v42_v3, %v42_v3  ;;  %v128_v5 = vld [vmem:[%s259_s2] ss:$0 sm:$0xff]  ;;  %s118_s25 = sshll.u32 %s224_s1, 4  ;;  %s119_s25 = int_to_ptr.vmem [resolvable:$true] %s118_s25 }
  0x1d   :  { %137 = vmatprep.subr.bf16.mxu0 %v222_v0  ;;  %s192_s26 = scalar_lea.vmem %s119_s25, 128  ;;  %p197_p11 = scmp.lt.s32.totalorder %s119_s25, %s119_s25 }
  0x1e   :  { %p193_p10 = scmp.ne.s32.totalorder %s119_s25, %s192_s26  ;;  %p198_p12 = scmp.lt.s32.totalorder %s192_s26, %s192_s26 }
  0x20   :  { %138 = vmatpush3.bf16.msra.mxu0 %v151_v2  ;;  %p199_p13 = por %p198_p12, %p197_p11 }
  0x22   :  { %p200_p0 = pnand %p199_p13, %p193_p10 }
  0x23   :  { %140 = vmatmul.mubr.msk.bf16.vlgmr.msra.gmra.mxu0 %vm67_vm1, %v43_v4 }
  0xe3   :  { %v105_v6 = vpop.f32.mrf.mxu0 }
  0xe4   :  { %v106_v7 = vadd.f32 %v128_v5, %v105_v6 }
  0xe5   :  { %v141_v8 = vpop.f32.mrf.mxu0 }
  0xe6   :  { %111 = vst.msk [vmem:[#allocation7] sm:$0xff] %vm67_vm1, %v106_v7 }
  0xe7   :  { %v108_v9 = vpop.f32.mrf.mxu0 }
  0xe8   :  { %203 = shalt.err (!%p200_p0)
}
  0xe9   :  { %121 = dma.vmem_to_hbm [thread:$0]  %s119_s25, 128, %s260_s3, [#allocation4]   ;;  %v142_v10 = vpop.f32.mrf.mxu0 }
  0xea   :  { %216 = dma.done.wait [#allocation4], 128  }
  0xeb   :  { %217 = vsyncadd [#allocation4], 4294967168 }
  0xec   :  { %125 = vsyncpa [#allocation3], 1 }
  0xed   :  { %126 = vsyncpa [#allocation6], 1 }
  0xee   :  { %127 = vsyncpa [#allocation4], 1 }

</bundles_post_ra>
